<compile_context>
chip_gen: v7x
topology: tpu7x:2x2x1
jax: 0.10.0
libtpu: 0.0.40
codegen_flags: <defaults>
</compile_context>

<pallas_src>
import jax
import jax.numpy as jnp
from jax.experimental import pallas as pl
from jax.experimental.pallas import tpu as pltpu


def mlp_kernel(x_ref, w1_ref, b1_ref, w23_ref, b23_ref, o_ref):
    # x streamed as f32; cast to bf16 for the MXU (f32 accumulation).
    x = x_ref[...].astype(jnp.bfloat16)                                  # [TB, Dp]
    h1 = jnp.dot(x, w1_ref[...], preferred_element_type=jnp.float32)     # MXU
    h1 = jnp.maximum(h1 + b1_ref[...], 0.0)                              # bias + ReLU (f32, VPU)
    # Folded Linear2 -> Dropout(identity) -> Linear3: VPU multiply + lane (XLU)
    # reduction instead of a lane-sparse [*,1] MXU matmul; scalar bias from SMEM.
    out = jnp.sum(h1 * w23_ref[...], axis=-1, keepdims=True) + b23_ref[0]
    o_ref[...] = out                                                     # [TB, 1] f32


def _round_up(n, m):
    return ((n + m - 1) // m) * m


def _pad2(a, shape):
    pads = [(0, t - s) for s, t in zip(a.shape, shape)]
    if all(p == (0, 0) for p in pads):
        return a
    return jnp.pad(a, pads)


def prepare_params(params):
    """One-time fold / pad / cast of the MLP parameters (hoisted out of the forward path)."""
    w1, b1, w2, b2, w3, b3 = (params[k] for k in ("w1", "b1", "w2", "b2", "w3", "b3"))
    D = w1.shape[0]
    Dp = _round_up(D, 128)
    f32 = jnp.float32
    # Algebraic fold (exact at inference, where Dropout is identity):
    #   (h1 @ w2 + b2) @ w3 + b3 = h1 @ (w2 @ w3) + (b2 @ w3 + b3)
    w23 = jnp.dot(w2.astype(f32), w3.astype(f32))                        # [D, 1]
    b23 = jnp.dot(b2.astype(f32), w3.astype(f32)) + b3.astype(f32)       # [1, 1]
    return {
        "w1": _pad2(w1, (Dp, Dp)).astype(jnp.bfloat16),                  # MXU operand
        "b1": _pad2(b1.astype(f32), (1, Dp)),                            # f32 (VPU)
        "w23": _pad2(w23.T.astype(f32), (1, Dp)),                        # f32 row (VPU)
        "b23": b23.reshape((1,)).astype(f32),                            # SMEM scalar
    }


def _vmem_budget_bytes():
    """Usable scoped-VMEM budget for this chip generation, leaving headroom."""
    try:
        cap = int(pltpu.get_tpu_info().vmem_capacity_bytes)
    except Exception:            # conservative fallback: v7x's 64 MiB per-TC scratchpad
        cap = 64 << 20
    # ~13/16 of physical: ~52 MiB on v7x, ~104 MiB on v5e/v6e -> room for compiler scratch.
    return (cap * 13) // 16


def _choose_batch_tile(B, Dp, vmem_budget, w1_bytes):
    """Largest batch tile that fits VMEM (amortizes ~0.35us/step pipeline overhead),
    split into >=2 tiles when B is big enough for both v7x TensorCores, and rounded
    to 8 rows so batch-padding waste stays small."""
    # Per-row bytes while a tile is in flight: f32 x block (double buffered) 8*Dp,
    # in-kernel bf16 copy 2*Dp, f32 h1 4*Dp, plus slack for temporaries.
    per_row = 18 * Dp
    resident = 2 * w1_bytes + 6 * 4 * Dp             # (possibly double-buffered) w1 + b1/w23 rows
    tb_cap = max((vmem_budget - resident) // per_row, 16)
    tb_cap = int(min(tb_cap, 4096))                  # beyond this, per-step overhead is amortized
    min_tiles = 2 if B >= 256 else 1                 # give v7x's second TensorCore work
    n_tiles = max(pl.cdiv(B, tb_cap), min_tiles)
    return max(_round_up(pl.cdiv(B, n_tiles), 8), 8)


@jax.jit
def mlp_forward(x, prep):
    """x: [B, D] float32; prep: output of prepare_params()."""
    B, D = x.shape
    Dp = prep["w1"].shape[0]
    w1_bytes = Dp * Dp * 2                           # bf16

    vmem_budget = _vmem_budget_bytes()
    TB = _choose_batch_tile(B, Dp, vmem_budget, w1_bytes)
    Bp = _round_up(B, TB)
    n_tiles = Bp // TB

    # Zero-padding is exact (padded feature columns / batch rows contribute zero; padded
    # batch rows are sliced away below).  No-op when D % 128 == 0 and B % TB == 0; x stays
    # f32 here — the bf16 cast happens inside the kernel.
    xp = _pad2(x.astype(jnp.float32), (Bp, Dp))

    # Scoped VMEM: double-buffered x/out tiles + resident weights + f32/bf16 intermediates,
    # with 2x slack, clamped to the per-generation budget (never the full physical VMEM).
    est = (2 * TB * Dp * 4        # x tiles (f32, double-buffered)
           + 2 * TB * 4           # output tiles
           + 2 * w1_bytes         # w1 (+ spare pipeline buffer)
           + 6 * Dp * 4           # b1 / w23 rows
           + TB * Dp * 6)         # f32 h1 + in-kernel bf16 x copy
    vmem_limit = int(min(max(2 * est, 8 << 20), vmem_budget))

    out = pl.pallas_call(
        mlp_kernel,
        out_shape=jax.ShapeDtypeStruct((Bp, 1), jnp.float32),
        grid=(n_tiles,),
        in_specs=[
            pl.BlockSpec((TB, Dp), lambda i: (i, 0)),            # x: streamed per batch tile
            pl.BlockSpec((Dp, Dp), lambda i: (0, 0)),            # w1: VMEM-resident (DMA'd once)
            pl.BlockSpec((1, Dp), lambda i: (0, 0)),             # b1
            pl.BlockSpec((1, Dp), lambda i: (0, 0)),             # w23 = w2 @ w3 row
            pl.BlockSpec(memory_space=pltpu.MemorySpace.SMEM),   # b23 scalar in SMEM
        ],
        out_specs=pl.BlockSpec((TB, 1), lambda i: (i, 0)),
        compiler_params=pltpu.CompilerParams(
            dimension_semantics=("parallel",),                   # batch tiles -> v7x megacore
            vmem_limit_bytes=vmem_limit,
        ),
    )(xp, prep["w1"], prep["b1"], prep["w23"], prep["b23"])

    return out[:B]                                               # [B, 1]


def init_params(key, input_dim):
    """Deterministic init mimicking torch.nn.Linear default U(-1/sqrt(fan_in), 1/sqrt(fan_in))."""
    ks = jax.random.split(key, 6)
    bound = 1.0 / jnp.sqrt(input_dim)
    w1 = jax.random.uniform(ks[0], (input_dim, input_dim), jnp.float32, -bound, bound)
    b1 = jax.random.uniform(ks[1], (1, input_dim), jnp.float32, -bound, bound)
    w2 = jax.random.uniform(ks[2], (input_dim, input_dim), jnp.float32, -bound, bound)
    b2 = jax.random.uniform(ks[3], (1, input_dim), jnp.float32, -bound, bound)
    w3 = jax.random.uniform(ks[4], (input_dim, 1), jnp.float32, -bound, bound)
    b3 = jax.random.uniform(ks[5], (1, 1), jnp.float32, -bound, bound)
    return {"w1": w1, "b1": b1, "w2": w2, "b2": b2, "w3": w3, "b3": b3}


def mlp_reference(x, p, *, kernel_policy=False):
    """Pure-JAX eval-mode reference.  kernel_policy=True mirrors the kernel's dtype /
    fold policy (bf16 first matmul with f32 accumulation, folded Linear2/Linear3)."""
    if kernel_policy:
        c = lambda a: a.astype(jnp.bfloat16).astype(jnp.float32)
        h1 = jnp.maximum(jnp.dot(c(x), c(p["w1"])) + p["b1"], 0.0)
        w23 = jnp.dot(p["w2"], p["w3"])
        b23 = jnp.dot(p["b2"], p["w3"]) + p["b3"]
        return jnp.dot(h1, w23) + b23
    h1 = jnp.maximum(jnp.dot(x, p["w1"]) + p["b1"], 0.0)
    h2 = jnp.dot(h1, p["w2"]) + p["b2"]
    return jnp.dot(h2, p["w3"]) + p["b3"]


if __name__ == "__main__":
    key = jax.random.PRNGKey(0)
    k_param, k_x = jax.random.split(key)

    batch, input_dim = 8, 32
    params = init_params(k_param, input_dim)
    x = jax.random.normal(k_x, (batch, input_dim), jnp.float32)

    prep = prepare_params(params)                    # one-time pad/cast/fold
    out = jax.block_until_ready(mlp_forward(x, prep))
    assert out.shape == (batch, 1), out.shape

    # Tight check vs. a reference mirroring the kernel's dtype/fold policy.
    ref_kp = mlp_reference(x, params, kernel_policy=True)
    assert jnp.allclose(out, ref_kp, atol=1e-2, rtol=1e-2), "mismatch vs kernel-policy reference"

    # Looser check vs. the exact fp32 module semantics (bf16 cast error only).
    ref_f32 = mlp_reference(x, params, kernel_policy=False)
    assert jnp.allclose(out, ref_f32, atol=5e-2, rtol=5e-2), "mismatch vs fp32 reference"

    print("KERNEL_OK")
</pallas_src>

<mosaic_0001>
module attributes {stable_mosaic.version = 11 : i64} {
  func.func @mlp_kernel(%arg0: i32, %arg1: memref<8x128xf32, #tpu.memory_space<vmem>>, %arg2: memref<128x128xbf16, #tpu.memory_space<vmem>>, %arg3: memref<1x128xf32, #tpu.memory_space<vmem>>, %arg4: memref<1x128xf32, #tpu.memory_space<vmem>>, %arg5: memref<1xf32, #tpu.memory_space<smem>>, %arg6: memref<8x1xf32, #tpu.memory_space<vmem>>) attributes {dimension_semantics = [#tpu.dimension_semantics<parallel>], iteration_bounds = array<i64: 1>, scalar_prefetch = 0 : i64, scratch_operands = 0 : i64, tpu.core_type = #tpu.core_type<tc>, window_params = [{transform_indices = @transform_0, window_bounds = array<i64: 8, 128>}, {pipeline_mode = #tpu.pipeline_mode<synchronous>, transform_indices = @transform_1, window_bounds = array<i64: 128, 128>}, {pipeline_mode = #tpu.pipeline_mode<synchronous>, transform_indices = @transform_2, window_bounds = array<i64: 1, 128>}, {pipeline_mode = #tpu.pipeline_mode<synchronous>, transform_indices = @transform_3, window_bounds = array<i64: 1, 128>}, {transform_indices = @transform_4, window_bounds = array<i64: 1>}, {transform_indices = @transform_5, window_bounds = array<i64: 8, 1>}]} {
    %c0 = arith.constant 0 : index
    %c0_0 = arith.constant 0 : index
    %0 = vector.load %arg1[%c0, %c0_0] : memref<8x128xf32, #tpu.memory_space<vmem>>, vector<8x128xf32>
    %1 = arith.truncf %0 : vector<8x128xf32> to vector<8x128xbf16>
    %c0_1 = arith.constant 0 : index
    %c0_2 = arith.constant 0 : index
    %2 = vector.load %arg2[%c0_1, %c0_2] : memref<128x128xbf16, #tpu.memory_space<vmem>>, vector<128x128xbf16>
    %cst = arith.constant dense<0.000000e+00> : vector<8x128xf32>
    %3 = tpu.matmul %1, %2, %cst {dimension_numbers = #tpu.dot_dimension_numbers<[1], [0], [0], [1], [0, 0, 1, 1], [], []>} : vector<8x128xbf16>, vector<128x128xbf16>, vector<8x128xf32> -> vector<8x128xf32>
    %c0_3 = arith.constant 0 : index
    %c0_4 = arith.constant 0 : index
    %4 = vector.load %arg3[%c0_3, %c0_4] : memref<1x128xf32, #tpu.memory_space<vmem>>, vector<1x128xf32>
    %5 = vector.broadcast %4 : vector<1x128xf32> to vector<8x128xf32>
    %6 = arith.addf %3, %5 : vector<8x128xf32>
    %cst_5 = arith.constant 0.000000e+00 : f32
    %7 = vector.broadcast %cst_5 : f32 to vector<8x128xf32>
    %8 = arith.maximumf %6, %7 : vector<8x128xf32>
    %c0_6 = arith.constant 0 : index
    %c0_7 = arith.constant 0 : index
    %9 = vector.load %arg4[%c0_6, %c0_7] : memref<1x128xf32, #tpu.memory_space<vmem>>, vector<1x128xf32>
    %10 = vector.broadcast %9 : vector<1x128xf32> to vector<8x128xf32>
    %11 = arith.mulf %8, %10 : vector<8x128xf32>
    %cst_8 = arith.constant dense<0.000000e+00> : vector<8xf32>
    %12 = vector.multi_reduction <add>, %11, %cst_8 [1] : vector<8x128xf32> to vector<8xf32>
    %13 = vector.shape_cast %12 : vector<8xf32> to vector<8x1xf32>
    %c0_9 = arith.constant 0 : index
    %14 = memref.load %arg5[%c0_9] : memref<1xf32, #tpu.memory_space<smem>>
    %15 = vector.broadcast %14 : f32 to vector<8x1xf32>
    %16 = arith.addf %13, %15 : vector<8x1xf32>
    %c0_10 = arith.constant 0 : index
    %c0_11 = arith.constant 0 : index
    %17 = vector.load %arg6[%c0_10, %c0_11] : memref<8x1xf32, #tpu.memory_space<vmem>>, vector<8x1xf32>
    tpu.vector_store %arg6[%c0_10, %c0_11], %16 {strides = array<i32>} : memref<8x1xf32, #tpu.memory_space<vmem>>, vector<8x1xf32>,
    return
  }
  func.func @transform_0(%arg0: i32) -> (i32, i32) {
    %c0_i32 = arith.constant 0 : i32
    %c0_i32_0 = arith.constant 0 : i32
    return %arg0, %c0_i32 : i32, i32
  }
  func.func @transform_1(%arg0: i32) -> (i32, i32) {
    %c0_i32 = arith.constant 0 : i32
    %c0_i32_0 = arith.constant 0 : i32
    %c0_i32_1 = arith.constant 0 : i32
    return %c0_i32, %c0_i32_0 : i32, i32
  }
  func.func @transform_2(%arg0: i32) -> (i32, i32) {
    %c0_i32 = arith.constant 0 : i32
    %c0_i32_0 = arith.constant 0 : i32
    %c0_i32_1 = arith.constant 0 : i32
    return %c0_i32, %c0_i32_0 : i32, i32
  }
  func.func @transform_3(%arg0: i32) -> (i32, i32) {
    %c0_i32 = arith.constant 0 : i32
    %c0_i32_0 = arith.constant 0 : i32
    %c0_i32_1 = arith.constant 0 : i32
    return %c0_i32, %c0_i32_0 : i32, i32
  }
  func.func @transform_4(%arg0: i32) -> i32 {
    %c0_i32 = arith.constant 0 : i32
    %c0_i32_0 = arith.constant 0 : i32
    return %c0_i32 : i32
  }
  func.func @transform_5(%arg0: i32) -> (i32, i32) {
    %c0_i32 = arith.constant 0 : i32
    %c0_i32_0 = arith.constant 0 : i32
    return %arg0, %c0_i32 : i32, i32
  }
}

</mosaic_0001>

<bundles_post_ra>
// kernel: mlp_forward.1
= control target key start
LH: loop header
LB: loop body
LE: loop exit
PB: predicated region body
PF: predicated region fallthrough
CT: control target
= control target key end

     0   :  { %11 = vsyncpa [#allocation4], 0  ;;  %s246_s18 = smov [#allocation3]   ;;  %s308_s0 = inlined_call_operand.vmem [shape: f32[8,128], index: 0, kind: input, shape index: {}]   ;;  %s309_s1 = inlined_call_operand.hbm [shape: bf16[128,128], index: 1, kind: input, shape index: {}]   ;;  %s310_s2 = inlined_call_operand.vmem [shape: f32[1,128], index: 2, kind: input, shape index: {}]   ;;  %s311_s3 = inlined_call_operand.vmem [shape: f32[1,128], index: 3, kind: input, shape index: {}]   ;;  %s312_s4 = inlined_call_operand.<no memory space> [shape: f32[1], index: 4, kind: input, shape index: {}]   ;;  %s313_s5 = inlined_call_operand.vmem [shape: f32[8,1], index: 5, kind: output, shape index: {}]  }
   0x1   :  { %s19_s19 = sshll.u32 %s246_s18, 4  ;;  %s222_s22 = scalar_lea.hbm %s309_s1, 1024  ;;  %s20_s19 = int_to_ptr.vmem [resolvable:$true] %s19_s19 }
   0x2   :  { %p223_p0 = scmp.ne.s32.totalorder %s309_s1, %s222_s22  ;;  %p226_p1 = scmp.lt.u32.totalorder %s222_s22, %s309_s1 }
   0x4   :  { %p228_p2 = pnand %p226_p1, %p223_p0 }
   0x6   :  { %231 = shalt.err (!%p228_p2)
}
   0x7   :  { %s232_s27 = scalar_lea.vmem %s20_s19, 1024  ;;  %p237_p4 = scmp.lt.s32.totalorder %s20_s19, %s20_s19 }
   0x8   :  { %p233_p3 = scmp.ne.s32.totalorder %s20_s19, %s232_s27  ;;  %p238_p5 = scmp.lt.s32.totalorder %s232_s27, %s232_s27 }
   0xa   :  { %p239_p6 = por %p238_p5, %p237_p4 }
   0xc   :  { %p240_p7 = pnand %p239_p6, %p233_p3 }
   0xe   :  { %243 = shalt.err (!%p240_p7)
}
   0xf   :  { %s247_s28 = smov 64   ;;  %s248_s29 = smov 4  }
  0x10   :  { %25 = dma.hbm_to_vmem [thread:$0]  %s309_s1, 1024, %s20_s19, [#allocation4], %s247_s28, %s247_s28, %s248_s29  }
  0x11   :  { %244 = dma.done.wait [#allocation4], 1024  }
  0x12   :  { %245 = vsyncadd [#allocation4], 4294966272  ;;  %v249_v0 = vmov 0.0   ;;  %vm250_vm0 = vmmov 0   ;;  %v214_v1 = vld [vmem:[#allocation3] sm:$0xff]   ;;  %v215_v2 = vld [vmem:[#allocation3 + $0x8] sm:$0xff]   ;;  %v161_v20 = vstv %s312_s4 }
  0x13   :  { %189 = vmatprep.subr.bf16.mxu0 %v249_v0  ;;  %205 = vmatprep.mubr.msk.bf16.mxu0 %vm250_vm0, %v249_v0  ;;  %v216_v3 = vld [vmem:[#allocation3 + $0x10] sm:$0xff]   ;;  %v217_v4 = vld [vmem:[#allocation3 + $0x18] sm:$0xff]   ;;  %v218_v5 = vld [vmem:[#allocation3 + $0x20] sm:$0xff]   ;;  %vm163_vm1 = vcmask 7168  }
  0x14   :  { %190 = vmatpush3.bf16.msra.mxu0 %v214_v1  ;;  %v219_v6 = vld [vmem:[#allocation3 + $0x28] sm:$0xff]   ;;  %v220_v7 = vld [vmem:[#allocation3 + $0x30] sm:$0xff]   ;;  %v221_v8 = vld [vmem:[#allocation3 + $0x38] sm:$0xff]  }
  0x15   :  { %191 = vmatprep.subr.bf16.mxu0 %v249_v0  ;;  %v36_v9 = vld [vmem:[%s308_s0] sm:$0xff] }
  0x16   :  { %v37_v10 = vpack.c.bf16 %v36_v9, %v36_v9  ;;  %v170_v11 = vld [vmem:[%s310_s2] ss:$0 sm:$0xff] }
  0x17   :  { %v179_v16 = vld [vmem:[%s311_s3] ss:$0 sm:$0xff] }
  0x18   :  { %192 = vmatpush3.bf16.msra.mxu0 %v215_v2 }
  0x19   :  { %193 = vmatprep.subr.bf16.mxu0 %v249_v0 }
  0x1c   :  { %194 = vmatpush3.bf16.msra.mxu0 %v216_v3 }
  0x1d   :  { %195 = vmatprep.subr.bf16.mxu0 %v249_v0 }
  0x20   :  { %196 = vmatpush3.bf16.msra.mxu0 %v217_v4 }
  0x21   :  { %197 = vmatprep.subr.bf16.mxu0 %v249_v0 }
  0x24   :  { %198 = vmatpush3.bf16.msra.mxu0 %v218_v5 }
  0x25   :  { %199 = vmatprep.subr.bf16.mxu0 %v249_v0 }
  0x28   :  { %200 = vmatpush3.bf16.msra.mxu0 %v219_v6 }
  0x29   :  { %201 = vmatprep.subr.bf16.mxu0 %v249_v0 }
  0x2c   :  { %202 = vmatpush3.bf16.msra.mxu0 %v220_v7 }
  0x2d   :  { %203 = vmatprep.subr.bf16.mxu0 %v249_v0 }
  0x30   :  { %204 = vmatpush3.bf16.msra.mxu0 %v221_v8 }
  0x33   :  { %206 = vmatmul.mubr.bf16.vlgmr.msra.gmra.mrb[0].mxu0 %v37_v10 }
 0x106   :  { %v143_v12 = vpop.f32.mrb[0].mxu0 }
 0x107   :  { %v144_v13 = vadd.f32 %v170_v11, %v143_v12  ;;  %v207_v14 = vpop.f32.mrb[1].mxu0 }
 0x108   :  { %v146_v15 = vpop.f32.mrb[2].mxu0 }
 0x109   :  { %v149_v17 = vmax.f32 %v144_v13, 0.0  ;;  %v208_v18 = vpop.f32.mrb[3].mxu0 }
 0x10b   :  { %v157_v19 = vmul.f32 %v179_v16, %v149_v17 }
 0x10d   :  { %158 = vadd.xlane.f32.xlu0 %v157_v19 }
 0x19a   :  { %v159_v21 = vpop.xlane.xlu0 %158 }
 0x19b   :  { %v162_v22 = vadd.f32 %v161_v20, %v159_v21 }
 0x19d   :  { %164 = vst.msk [vmem:[%s313_s5] sm:$0xff] %vm163_vm1, %v162_v22 }
 0x19e   :  { %169 = vsyncpa [#allocation4], 1 }

</bundles_post_ra>
